<compile_context>
chip_gen: v7x
topology: tpu7x:2x2x1
jax: 0.10.0
libtpu: 0.0.40
codegen_flags: <defaults>
</compile_context>

<pallas_src>
import functools

import jax
import jax.numpy as jnp
from jax.experimental import pallas as pl
from jax.experimental.pallas import tpu as pltpu

HIDDEN1, HIDDEN2, HIDDEN3 = 500, 100, 30
LANE = 128
_MIB = 1024 * 1024
# Conservative per-grid-step VMEM budget (works for v5e / v6e / v7x).
_VMEM_STEP_BUDGET = 24 * _MIB


def _round_up(n, m):
    return ((n + m - 1) // m) * m


def _mlp_kernel(x_ref, w1_ref, b1_ref, w2_ref, b2_ref, w3_ref, b3_ref,
                w4_ref, b4_ref, o_ref):
    # x arrives in f32; cast to bf16 right before the first dot (hides under MXU).
    x = x_ref[...].astype(jnp.bfloat16)
    # Layer 1: (Bt, Din_p) @ (Din_p, 512) -> f32 accum; bias + ReLU in f32 (VPU).
    h = jnp.dot(x, w1_ref[...], preferred_element_type=jnp.float32)
    h = jnp.maximum(h + b1_ref[...], 0.0)
    # Layer 2: (Bt, 512) @ (512, 128)
    h = jnp.dot(h.astype(jnp.bfloat16), w2_ref[...],
                preferred_element_type=jnp.float32)
    h = jnp.maximum(h + b2_ref[...], 0.0)
    # Layer 3: (Bt, 128) @ (128, 128)
    h = jnp.dot(h.astype(jnp.bfloat16), w3_ref[...],
                preferred_element_type=jnp.float32)
    h = jnp.maximum(h + b3_ref[...], 0.0)
    # Layer 4 (logits, no activation): (Bt, 128) @ (128, C_pad)
    h = jnp.dot(h.astype(jnp.bfloat16), w4_ref[...],
                preferred_element_type=jnp.float32)
    o_ref[...] = (h + b4_ref[...]).astype(o_ref.dtype)


def prepare_params(params):
    """Pad weights/biases to lane-dense shapes and cast to bf16/f32 ONCE.

    Call at init time — NOT per forward call.  Weights are stored as
    (in, out) = transpose of torch's (out, in); biases as (1, out).
    """
    d_in = params["w1"].shape[0]
    num_classes = params["w4"].shape[1]
    d_in_p = _round_up(d_in, LANE)
    h1_p = _round_up(HIDDEN1, LANE)   # 512
    h2_p = _round_up(HIDDEN2, LANE)   # 128
    h3_p = _round_up(HIDDEN3, LANE)   # 128
    c_p = _round_up(num_classes, LANE)

    def pad2(a, rows, cols, dtype):
        a = jnp.pad(a, ((0, rows - a.shape[0]), (0, cols - a.shape[1])))
        return a.astype(dtype)

    return {
        "w1": pad2(params["w1"], d_in_p, h1_p, jnp.bfloat16),
        "b1": pad2(params["b1"], 1, h1_p, jnp.float32),
        "w2": pad2(params["w2"], h1_p, h2_p, jnp.bfloat16),
        "b2": pad2(params["b2"], 1, h2_p, jnp.float32),
        "w3": pad2(params["w3"], h2_p, h3_p, jnp.bfloat16),
        "b3": pad2(params["b3"], 1, h3_p, jnp.float32),
        "w4": pad2(params["w4"], h3_p, c_p, jnp.bfloat16),
        "b4": pad2(params["b4"], 1, c_p, jnp.float32),
    }


def _step_vmem_bytes(bt, d_in_p, c_p, weight_bytes):
    """Conservative per-grid-step VMEM estimate for a (bt,)-row tile."""
    x_io = 2 * bt * d_in_p * 4            # f32 x tile, double-buffered
    out_io = 2 * bt * c_p * 4             # f32 out tile, double-buffered
    acts = bt * (2 * d_in_p                                   # bf16 cast of x
                 + 6 * (_round_up(HIDDEN1, LANE)
                        + _round_up(HIDDEN2, LANE)
                        + _round_up(HIDDEN3, LANE))           # f32 + bf16 hidden
                 + 4 * c_p)                                   # f32 logits
    return x_io + out_io + acts + 2 * weight_bytes            # dbl-buffered weights


@functools.partial(jax.jit, static_argnames=("num_classes", "block_b"))
def red_neuronal3_relu_forward(x, prep, *, num_classes, block_b=2048):
    """Fused 4-layer MLP forward.

    x: (B, input_size) float32
    prep: output of prepare_params() (padded bf16 weights / f32 biases)
    returns: (B, num_classes) float32 logits.
    """
    B, d_in = x.shape
    d_in_p = prep["w1"].shape[0]
    h1_p = prep["w1"].shape[1]
    h2_p = prep["w2"].shape[1]
    h3_p = prep["w3"].shape[1]
    c_p = prep["w4"].shape[1]
    weight_bytes = sum(int(a.size) * a.dtype.itemsize for a in prep.values())

    # ---- batch tile: as big as possible (amortize the ~0.35us/step cost),
    #      capped only by the per-step VMEM budget.  No artificial split for
    #      small batches (that was pure overhead on single-TC v5e/v6e).
    b_min = _round_up(B, 8)
    bt = _round_up(min(block_b, b_min), 8)
    while bt > 8 and _step_vmem_bytes(bt, d_in_p, c_p, weight_bytes) > _VMEM_STEP_BUDGET:
        bt = max(8, _round_up(bt // 2, 8))
    n_steps = pl.cdiv(b_min, bt)
    if n_steps > 1:
        # v7x megacore: keep an even number of grid steps so both TensorCores
        # get equal work, rebalancing the tile so each step stays large.
        n_steps = _round_up(n_steps, 2)
        bt = _round_up(pl.cdiv(b_min, n_steps), 8)
    b_pad = n_steps * bt
    grid = (n_steps,)

    # ---- per-call x prep: zero-pad rows/lanes in f32 only if needed; the bf16
    #      cast happens inside the kernel (no extra HBM round trip for x).
    x_p = x
    if (b_pad, d_in_p) != (B, d_in):
        x_p = jnp.pad(x, ((0, b_pad - B), (0, d_in_p - d_in)))

    def full_spec(arr):
        # Constant index_map -> each weight/bias is DMA'd once and stays
        # resident in VMEM across all grid steps (total is only ~weight_bytes).
        return pl.BlockSpec(arr.shape, lambda i: (0, 0))

    in_specs = [
        pl.BlockSpec((bt, d_in_p), lambda i: (i, 0)),     # x tile (f32)
        full_spec(prep["w1"]), full_spec(prep["b1"]),
        full_spec(prep["w2"]), full_spec(prep["b2"]),
        full_spec(prep["w3"]), full_spec(prep["b3"]),
        full_spec(prep["w4"]), full_spec(prep["b4"]),
    ]
    # Lane-dense (bt, c_p) output tile -> unmasked full-width stores.
    out_spec = pl.BlockSpec((bt, c_p), lambda i: (i, 0))

    flops = 2 * b_pad * (d_in_p * h1_p + h1_p * h2_p + h2_p * h3_p + h3_p * c_p)
    bytes_accessed = b_pad * d_in_p * 4 + b_pad * c_p * 4 + weight_bytes
    cost = pl.CostEstimate(flops=flops, transcendentals=0,
                           bytes_accessed=bytes_accessed)

    step_bytes = _step_vmem_bytes(bt, d_in_p, c_p, weight_bytes)
    vmem_limit = int(min(48 * _MIB, max(32 * _MIB, 2 * step_bytes)))

    out_padded = pl.pallas_call(
        _mlp_kernel,
        out_shape=jax.ShapeDtypeStruct((b_pad, c_p), jnp.float32),
        grid=grid,
        in_specs=in_specs,
        out_specs=out_spec,
        compiler_params=pltpu.CompilerParams(
            dimension_semantics=("parallel",),
            vmem_limit_bytes=vmem_limit),
        cost_estimate=cost,
    )(x_p, prep["w1"], prep["b1"], prep["w2"], prep["b2"],
      prep["w3"], prep["b3"], prep["w4"], prep["b4"])

    # Slice padded batch rows / padded class lanes back to the logical shape.
    return out_padded[:B, :num_classes]


def init_params(key, input_size, num_classes):
    """Deterministic init mimicking nn.Linear (uniform +/- 1/sqrt(fan_in))."""
    dims = [(input_size, HIDDEN1), (HIDDEN1, HIDDEN2),
            (HIDDEN2, HIDDEN3), (HIDDEN3, num_classes)]
    params = {}
    for idx, (fan_in, fan_out) in enumerate(dims, start=1):
        key, kw, kb = jax.random.split(key, 3)
        bound = 1.0 / jnp.sqrt(jnp.float32(fan_in))
        # Stored as (in, out) = transpose of torch's (out, in) weight.
        params[f"w{idx}"] = jax.random.uniform(
            kw, (fan_in, fan_out), jnp.float32, -bound, bound)
        params[f"b{idx}"] = jax.random.uniform(
            kb, (1, fan_out), jnp.float32, -bound, bound)
    return params


def _reference_forward(x, params):
    h = jnp.maximum(x @ params["w1"] + params["b1"], 0.0)
    h = jnp.maximum(h @ params["w2"] + params["b2"], 0.0)
    h = jnp.maximum(h @ params["w3"] + params["b3"], 0.0)
    return h @ params["w4"] + params["b4"]


if __name__ == "__main__":
    key = jax.random.PRNGKey(0)
    batch, input_size, num_classes = 64, 64, 10

    key, kx, kp = jax.random.split(key, 3)
    x = jax.random.normal(kx, (batch, input_size), jnp.float32)
    params = init_params(kp, input_size, num_classes)

    # One-time weight prep (lane padding + bf16 cast) — NOT done per forward.
    prep = prepare_params(params)

    out = red_neuronal3_relu_forward(x, prep, num_classes=num_classes)
    out = jax.block_until_ready(out)

    ref = _reference_forward(x, params)
    assert out.shape == (batch, num_classes)
    # bf16 MXU inputs with f32 accumulation -> compare to the f32 reference
    # with a tolerance matching bf16 precision across 4 layers.
    assert jnp.allclose(out, ref, atol=5e-2, rtol=5e-2), "mismatch vs reference"
    print("KERNEL_OK")
</pallas_src>

<mosaic_0001>
module attributes {stable_mosaic.version = 11 : i64} {
  func.func @_mlp_kernel(%arg0: i32, %arg1: memref<64x128xf32, #tpu.memory_space<vmem>>, %arg2: memref<128x512xbf16, #tpu.memory_space<vmem>>, %arg3: memref<1x512xf32, #tpu.memory_space<vmem>>, %arg4: memref<512x128xbf16, #tpu.memory_space<vmem>>, %arg5: memref<1x128xf32, #tpu.memory_space<vmem>>, %arg6: memref<128x128xbf16, #tpu.memory_space<vmem>>, %arg7: memref<1x128xf32, #tpu.memory_space<vmem>>, %arg8: memref<128x128xbf16, #tpu.memory_space<vmem>>, %arg9: memref<1x128xf32, #tpu.memory_space<vmem>>, %arg10: memref<64x128xf32, #tpu.memory_space<vmem>>) attributes {dimension_semantics = [#tpu.dimension_semantics<parallel>], iteration_bounds = array<i64: 1>, scalar_prefetch = 0 : i64, scratch_operands = 0 : i64, tpu.core_type = #tpu.core_type<tc>, window_params = [{transform_indices = @transform_0, window_bounds = array<i64: 64, 128>}, {pipeline_mode = #tpu.pipeline_mode<synchronous>, transform_indices = @transform_1, window_bounds = array<i64: 128, 512>}, {pipeline_mode = #tpu.pipeline_mode<synchronous>, transform_indices = @transform_2, window_bounds = array<i64: 1, 512>}, {pipeline_mode = #tpu.pipeline_mode<synchronous>, transform_indices = @transform_3, window_bounds = array<i64: 512, 128>}, {pipeline_mode = #tpu.pipeline_mode<synchronous>, transform_indices = @transform_4, window_bounds = array<i64: 1, 128>}, {pipeline_mode = #tpu.pipeline_mode<synchronous>, transform_indices = @transform_5, window_bounds = array<i64: 128, 128>}, {pipeline_mode = #tpu.pipeline_mode<synchronous>, transform_indices = @transform_6, window_bounds = array<i64: 1, 128>}, {pipeline_mode = #tpu.pipeline_mode<synchronous>, transform_indices = @transform_7, window_bounds = array<i64: 128, 128>}, {pipeline_mode = #tpu.pipeline_mode<synchronous>, transform_indices = @transform_8, window_bounds = array<i64: 1, 128>}, {transform_indices = @transform_9, window_bounds = array<i64: 64, 128>}]} {
    %c0 = arith.constant 0 : index
    %c0_0 = arith.constant 0 : index
    %0 = vector.load %arg1[%c0, %c0_0] : memref<64x128xf32, #tpu.memory_space<vmem>>, vector<64x128xf32>
    %1 = arith.truncf %0 : vector<64x128xf32> to vector<64x128xbf16>
    %c0_1 = arith.constant 0 : index
    %c0_2 = arith.constant 0 : index
    %2 = vector.load %arg2[%c0_1, %c0_2] : memref<128x512xbf16, #tpu.memory_space<vmem>>, vector<128x512xbf16>
    %cst = arith.constant dense<0.000000e+00> : vector<64x512xf32>
    %3 = tpu.matmul %1, %2, %cst {dimension_numbers = #tpu.dot_dimension_numbers<[1], [0], [0], [1], [0, 0, 1, 1], [], []>} : vector<64x128xbf16>, vector<128x512xbf16>, vector<64x512xf32> -> vector<64x512xf32>
    %c0_3 = arith.constant 0 : index
    %c0_4 = arith.constant 0 : index
    %4 = vector.load %arg3[%c0_3, %c0_4] : memref<1x512xf32, #tpu.memory_space<vmem>>, vector<1x512xf32>
    %5 = vector.broadcast %4 : vector<1x512xf32> to vector<64x512xf32>
    %6 = arith.addf %3, %5 : vector<64x512xf32>
    %cst_5 = arith.constant 0.000000e+00 : f32
    %7 = vector.broadcast %cst_5 : f32 to vector<64x512xf32>
    %8 = arith.maximumf %6, %7 : vector<64x512xf32>
    %9 = arith.truncf %8 : vector<64x512xf32> to vector<64x512xbf16>
    %c0_6 = arith.constant 0 : index
    %c0_7 = arith.constant 0 : index
    %10 = vector.load %arg4[%c0_6, %c0_7] : memref<512x128xbf16, #tpu.memory_space<vmem>>, vector<512x128xbf16>
    %cst_8 = arith.constant dense<0.000000e+00> : vector<64x128xf32>
    %11 = tpu.matmul %9, %10, %cst_8 {dimension_numbers = #tpu.dot_dimension_numbers<[1], [0], [0], [1], [0, 0, 1, 1], [], []>} : vector<64x512xbf16>, vector<512x128xbf16>, vector<64x128xf32> -> vector<64x128xf32>
    %c0_9 = arith.constant 0 : index
    %c0_10 = arith.constant 0 : index
    %12 = vector.load %arg5[%c0_9, %c0_10] : memref<1x128xf32, #tpu.memory_space<vmem>>, vector<1x128xf32>
    %13 = vector.broadcast %12 : vector<1x128xf32> to vector<64x128xf32>
    %14 = arith.addf %11, %13 : vector<64x128xf32>
    %cst_11 = arith.constant 0.000000e+00 : f32
    %15 = vector.broadcast %cst_11 : f32 to vector<64x128xf32>
    %16 = arith.maximumf %14, %15 : vector<64x128xf32>
    %17 = arith.truncf %16 : vector<64x128xf32> to vector<64x128xbf16>
    %c0_12 = arith.constant 0 : index
    %c0_13 = arith.constant 0 : index
    %18 = vector.load %arg6[%c0_12, %c0_13] : memref<128x128xbf16, #tpu.memory_space<vmem>>, vector<128x128xbf16>
    %cst_14 = arith.constant dense<0.000000e+00> : vector<64x128xf32>
    %19 = tpu.matmul %17, %18, %cst_14 {dimension_numbers = #tpu.dot_dimension_numbers<[1], [0], [0], [1], [0, 0, 1, 1], [], []>} : vector<64x128xbf16>, vector<128x128xbf16>, vector<64x128xf32> -> vector<64x128xf32>
    %c0_15 = arith.constant 0 : index
    %c0_16 = arith.constant 0 : index
    %20 = vector.load %arg7[%c0_15, %c0_16] : memref<1x128xf32, #tpu.memory_space<vmem>>, vector<1x128xf32>
    %21 = vector.broadcast %20 : vector<1x128xf32> to vector<64x128xf32>
    %22 = arith.addf %19, %21 : vector<64x128xf32>
    %cst_17 = arith.constant 0.000000e+00 : f32
    %23 = vector.broadcast %cst_17 : f32 to vector<64x128xf32>
    %24 = arith.maximumf %22, %23 : vector<64x128xf32>
    %25 = arith.truncf %24 : vector<64x128xf32> to vector<64x128xbf16>
    %c0_18 = arith.constant 0 : index
    %c0_19 = arith.constant 0 : index
    %26 = vector.load %arg8[%c0_18, %c0_19] : memref<128x128xbf16, #tpu.memory_space<vmem>>, vector<128x128xbf16>
    %cst_20 = arith.constant dense<0.000000e+00> : vector<64x128xf32>
    %27 = tpu.matmul %25, %26, %cst_20 {dimension_numbers = #tpu.dot_dimension_numbers<[1], [0], [0], [1], [0, 0, 1, 1], [], []>} : vector<64x128xbf16>, vector<128x128xbf16>, vector<64x128xf32> -> vector<64x128xf32>
    %c0_21 = arith.constant 0 : index
    %c0_22 = arith.constant 0 : index
    %28 = vector.load %arg9[%c0_21, %c0_22] : memref<1x128xf32, #tpu.memory_space<vmem>>, vector<1x128xf32>
    %29 = vector.broadcast %28 : vector<1x128xf32> to vector<64x128xf32>
    %30 = arith.addf %27, %29 : vector<64x128xf32>
    %c0_23 = arith.constant 0 : index
    %c0_24 = arith.constant 0 : index
    %31 = vector.load %arg10[%c0_23, %c0_24] : memref<64x128xf32, #tpu.memory_space<vmem>>, vector<64x128xf32>
    tpu.vector_store %arg10[%c0_23, %c0_24], %30 {strides = array<i32>} : memref<64x128xf32, #tpu.memory_space<vmem>>, vector<64x128xf32>,
    return
  }
  func.func @transform_0(%arg0: i32) -> (i32, i32) {
    %c0_i32 = arith.constant 0 : i32
    %c0_i32_0 = arith.constant 0 : i32
    return %arg0, %c0_i32 : i32, i32
  }
  func.func @transform_1(%arg0: i32) -> (i32, i32) {
    %c0_i32 = arith.constant 0 : i32
    %c0_i32_0 = arith.constant 0 : i32
    %c0_i32_1 = arith.constant 0 : i32
    return %c0_i32, %c0_i32_0 : i32, i32
  }
  func.func @transform_2(%arg0: i32) -> (i32, i32) {
    %c0_i32 = arith.constant 0 : i32
    %c0_i32_0 = arith.constant 0 : i32
    %c0_i32_1 = arith.constant 0 : i32
    return %c0_i32, %c0_i32_0 : i32, i32
  }
  func.func @transform_3(%arg0: i32) -> (i32, i32) {
    %c0_i32 = arith.constant 0 : i32
    %c0_i32_0 = arith.constant 0 : i32
    %c0_i32_1 = arith.constant 0 : i32
    return %c0_i32, %c0_i32_0 : i32, i32
  }
  func.func @transform_4(%arg0: i32) -> (i32, i32) {
    %c0_i32 = arith.constant 0 : i32
    %c0_i32_0 = arith.constant 0 : i32
    %c0_i32_1 = arith.constant 0 : i32
    return %c0_i32, %c0_i32_0 : i32, i32
  }
  func.func @transform_5(%arg0: i32) -> (i32, i32) {
    %c0_i32 = arith.constant 0 : i32
    %c0_i32_0 = arith.constant 0 : i32
    %c0_i32_1 = arith.constant 0 : i32
    return %c0_i32, %c0_i32_0 : i32, i32
  }
  func.func @transform_6(%arg0: i32) -> (i32, i32) {
    %c0_i32 = arith.constant 0 : i32
    %c0_i32_0 = arith.constant 0 : i32
    %c0_i32_1 = arith.constant 0 : i32
    return %c0_i32, %c0_i32_0 : i32, i32
  }
  func.func @transform_7(%arg0: i32) -> (i32, i32) {
    %c0_i32 = arith.constant 0 : i32
    %c0_i32_0 = arith.constant 0 : i32
    %c0_i32_1 = arith.constant 0 : i32
    return %c0_i32, %c0_i32_0 : i32, i32
  }
  func.func @transform_8(%arg0: i32) -> (i32, i32) {
    %c0_i32 = arith.constant 0 : i32
    %c0_i32_0 = arith.constant 0 : i32
    %c0_i32_1 = arith.constant 0 : i32
    return %c0_i32, %c0_i32_0 : i32, i32
  }
  func.func @transform_9(%arg0: i32) -> (i32, i32) {
    %c0_i32 = arith.constant 0 : i32
    %c0_i32_0 = arith.constant 0 : i32
    return %arg0, %c0_i32 : i32, i32
  }
}

</mosaic_0001>

<bundles_post_ra>
// kernel: red_neuronal3_relu_forward.1
= control target key start
LH: loop header
LB: loop body
LE: loop exit
PB: predicated region body
PF: predicated region fallthrough
CT: control target
= control target key end

     0   :  { %14 = vsyncpa [#allocation3], 0  ;;  %s1821_s0 = inlined_call_operand.vmem [shape: f32[64,128], index: 0, kind: input, shape index: {}]   ;;  %s1822_s1 = inlined_call_operand.hbm [shape: bf16[128,512], index: 1, kind: input, shape index: {}]   ;;  %s1823_s2 = inlined_call_operand.vmem [shape: f32[1,512], index: 2, kind: input, shape index: {}]   ;;  %s1824_s3 = inlined_call_operand.hbm [shape: bf16[512,128], index: 3, kind: input, shape index: {}]   ;;  %s1825_s4 = inlined_call_operand.vmem [shape: f32[1,128], index: 4, kind: input, shape index: {}]   ;;  %s1826_s5 = inlined_call_operand.vmem [shape: bf16[128,128], index: 5, kind: input, shape index: {}]   ;;  %s1827_s6 = inlined_call_operand.vmem [shape: f32[1,128], index: 6, kind: input, shape index: {}]   ;;  %s1828_s7 = inlined_call_operand.vmem [shape: bf16[128,128], index: 7, kind: input, shape index: {}]   ;;  %s1829_s8 = inlined_call_operand.vmem [shape: f32[1,128], index: 8, kind: input, shape index: {}]   ;;  %s1830_s9 = inlined_call_operand.vmem [shape: f32[64,128], index: 9, kind: output, shape index: {}]  }
   0x1   :  { %15 = vsyncpa [#allocation5], 0  ;;  %s1570_s30 = smov [#allocation2]   ;;  %s1522_s13 = scalar_lea.hbm %s1822_s1, 4096 }
   0x2   :  { %s23_s10 = sshll.u32 %s1570_s30, 4  ;;  %p1523_p0 = scmp.ne.s32.totalorder %s1822_s1, %s1522_s13  ;;  %s24_s10 = int_to_ptr.vmem [resolvable:$true] %s23_s10 }
   0x3   :  { %p1526_p1 = scmp.lt.u32.totalorder %s1522_s13, %s1822_s1 }
   0x5   :  { %p1528_p2 = pnand %p1526_p1, %p1523_p0 }
   0x7   :  { %1531 = shalt.err (!%p1528_p2)
}
   0x8   :  { %s1532_s18 = scalar_lea.vmem %s24_s10, 4096  ;;  %p1537_p4 = scmp.lt.s32.totalorder %s24_s10, %s24_s10 }
   0x9   :  { %p1533_p3 = scmp.ne.s32.totalorder %s24_s10, %s1532_s18  ;;  %p1538_p5 = scmp.lt.s32.totalorder %s1532_s18, %s1532_s18 }
   0xb   :  { %p1539_p6 = por %p1538_p5, %p1537_p4 }
   0xd   :  { %p1540_p7 = pnand %p1539_p6, %p1533_p3 }
   0xf   :  { %1543 = shalt.err (!%p1540_p7)
}
  0x10   :  { %s1571_s19 = smov 256   ;;  %s1572_s20 = smov 16  }
  0x11   :  { %29 = dma.hbm_to_vmem [thread:$0]  %s1822_s1, 4096, %s24_s10, [#allocation3], %s1571_s19, %s1571_s19, %s1572_s20  }
  0x12   :  { %s1573_s23 = smov [#allocation4]   ;;  %s1544_s27 = scalar_lea.hbm %s1824_s3, 4096 }
  0x13   :  { %s37_s24 = sshll.u32 %s1573_s23, 4  ;;  %p1545_p8 = scmp.ne.s32.totalorder %s1824_s3, %s1544_s27  ;;  %s38_s24 = int_to_ptr.vmem [resolvable:$true] %s37_s24 }
  0x14   :  { %p1548_p9 = scmp.lt.u32.totalorder %s1544_s27, %s1824_s3 }
  0x16   :  { %p1550_p10 = pnand %p1548_p9, %p1545_p8 }
  0x18   :  { %1553 = shalt.err (!%p1550_p10)
}
  0x19   :  { %s1554_s12 = scalar_lea.vmem %s38_s24, 4096  ;;  %p1559_p12 = scmp.lt.s32.totalorder %s38_s24, %s38_s24 }
  0x1a   :  { %p1555_p11 = scmp.ne.s32.totalorder %s38_s24, %s1554_s12  ;;  %p1560_p13 = scmp.lt.s32.totalorder %s1554_s12, %s1554_s12 }
  0x1c   :  { %p1561_p0 = por %p1560_p13, %p1559_p12 }
  0x1e   :  { %p1562_p1 = pnand %p1561_p0, %p1555_p11 }
  0x20   :  { %1565 = shalt.err (!%p1562_p1)
}
  0x21   :  { %s1574_s1 = smov 64   ;;  %s1575_s10 = smov 4  }
  0x22   :  { %43 = dma.hbm_to_vmem [thread:$0]  %s1824_s3, 4096, %s38_s24, [#allocation5], %s1574_s1, %s1574_s1, %s1575_s10  }
  0x23   :  { %1566 = dma.done.wait [#allocation3], 4096  }
  0x24   :  { %1567 = vsyncadd [#allocation3], 4294963200 }
  0x25   :  { %1568 = dma.done.wait [#allocation5], 4096  }
  0x26   :  { %1569 = vsyncadd [#allocation5], 4294963200  ;;  %v1576_v0 = vmov 0   ;;  %v1426_v1 = vld [vmem:[#allocation2 + $0x4] ss:$16 sps:$4 sm:$0xff]   ;;  %v62_v34 = vld [vmem:[%s1821_s0 + $0x8] sm:$0xff] }
  0x27   :  { %319 = vmatprep.mubr.bf16.mxu0 %v1576_v0  ;;  %392 = vmatprep.mubr.bf16.mxu1 %v1576_v0  ;;  %v1428_v2 = vld [vmem:[#allocation2 + $0xc] ss:$16 sps:$4 sm:$0xff]   ;;  %v1430_v3 = vld [vmem:[#allocation2] ss:$16 sps:$4 sm:$0xff]   ;;  %v1431_v4 = vld [vmem:[#allocation2 + $0x8] ss:$16 sps:$4 sm:$0xff]  }
  0x28   :  { %287 = vmatprep.subr.bf16.mxu0 %v1426_v1  ;;  %360 = vmatprep.subr.bf16.mxu1 %v1428_v2  ;;  %v1432_v5 = vld [vmem:[#allocation2 + $0x24] ss:$16 sps:$4 sm:$0xff]   ;;  %v1434_v6 = vld [vmem:[#allocation2 + $0x2c] ss:$16 sps:$4 sm:$0xff]   ;;  %v1436_v7 = vld [vmem:[#allocation2 + $0x20] ss:$16 sps:$4 sm:$0xff]  }
  0x29   :  { %288 = vmatpush1.bf16.msra.mxu0 %v1430_v3  ;;  %361 = vmatpush1.bf16.msra.mxu1 %v1431_v4  ;;  %v1437_v8 = vld [vmem:[#allocation2 + $0x28] ss:$16 sps:$4 sm:$0xff]   ;;  %v1438_v9 = vld [vmem:[#allocation2 + $0x44] ss:$16 sps:$4 sm:$0xff]   ;;  %v1440_v10 = vld [vmem:[#allocation2 + $0x4c] ss:$16 sps:$4 sm:$0xff]  }
  0x2a   :  { %289 = vmatprep.subr.bf16.mxu0 %v1432_v5  ;;  %362 = vmatprep.subr.bf16.mxu1 %v1434_v6  ;;  %v1442_v11 = vld [vmem:[#allocation2 + $0x40] ss:$16 sps:$4 sm:$0xff]   ;;  %v1443_v12 = vld [vmem:[#allocation2 + $0x48] ss:$16 sps:$4 sm:$0xff]   ;;  %v1444_v13 = vld [vmem:[#allocation2 + $0x64] ss:$16 sps:$4 sm:$0xff]  }
  0x2b   :  { %v1446_v14 = vld [vmem:[#allocation2 + $0x6c] ss:$16 sps:$4 sm:$0xff]   ;;  %v1448_v15 = vld [vmem:[#allocation2 + $0x60] ss:$16 sps:$4 sm:$0xff]   ;;  %v1449_v16 = vld [vmem:[#allocation2 + $0x68] ss:$16 sps:$4 sm:$0xff]  }
  0x2c   :  { %v1450_v17 = vld [vmem:[#allocation2 + $0x84] ss:$16 sps:$4 sm:$0xff]   ;;  %v1452_v18 = vld [vmem:[#allocation2 + $0x8c] ss:$16 sps:$4 sm:$0xff]   ;;  %v1454_v19 = vld [vmem:[#allocation2 + $0x80] ss:$16 sps:$4 sm:$0xff]  }
  0x2d   :  { %290 = vmatpush1.bf16.msra.mxu0 %v1436_v7  ;;  %363 = vmatpush1.bf16.msra.mxu1 %v1437_v8  ;;  %v1455_v20 = vld [vmem:[#allocation2 + $0x88] ss:$16 sps:$4 sm:$0xff]   ;;  %v1456_v21 = vld [vmem:[#allocation2 + $0xa4] ss:$16 sps:$4 sm:$0xff]   ;;  %v1458_v22 = vld [vmem:[#allocation2 + $0xac] ss:$16 sps:$4 sm:$0xff]  }
  0x2e   :  { %291 = vmatprep.subr.bf16.mxu0 %v1438_v9  ;;  %364 = vmatprep.subr.bf16.mxu1 %v1440_v10  ;;  %v1460_v23 = vld [vmem:[#allocation2 + $0xa0] ss:$16 sps:$4 sm:$0xff]   ;;  %v1461_v24 = vld [vmem:[#allocation2 + $0xa8] ss:$16 sps:$4 sm:$0xff]   ;;  %v1462_v25 = vld [vmem:[#allocation2 + $0xc4] ss:$16 sps:$4 sm:$0xff]  }
  0x2f   :  { %v1464_v26 = vld [vmem:[#allocation2 + $0xcc] ss:$16 sps:$4 sm:$0xff]   ;;  %v1466_v27 = vld [vmem:[#allocation2 + $0xc0] ss:$16 sps:$4 sm:$0xff]   ;;  %v1467_v28 = vld [vmem:[#allocation2 + $0xc8] ss:$16 sps:$4 sm:$0xff]  }
  0x30   :  { %v1468_v29 = vld [vmem:[#allocation2 + $0xe4] ss:$16 sps:$4 sm:$0xff]   ;;  %v1470_v30 = vld [vmem:[#allocation2 + $0xec] ss:$16 sps:$4 sm:$0xff]   ;;  %v1472_v31 = vld [vmem:[#allocation2 + $0xe0] ss:$16 sps:$4 sm:$0xff]  }
  0x31   :  { %292 = vmatpush1.bf16.msra.mxu0 %v1442_v11  ;;  %365 = vmatpush1.bf16.msra.mxu1 %v1443_v12  ;;  %v1473_v32 = vld [vmem:[#allocation2 + $0xe8] ss:$16 sps:$4 sm:$0xff]   ;;  %v61_v33 = vld [vmem:[%s1821_s0] sm:$0xff]  ;;  %v63_v41 = vld [vmem:[%s1821_s0 + $0x10] sm:$0xff] }
  0x32   :  { %293 = vmatprep.subr.bf16.mxu0 %v1444_v13  ;;  %366 = vmatprep.subr.bf16.mxu1 %v1446_v14  ;;  %v1474_v35 = vld [vmem:[#allocation4 + $0x40] sm:$0xff]   ;;  %v69_v37 = vpack.c.bf16 %v62_v34, %v61_v33  ;;  %v1478_v40 = vld [vmem:[#allocation4 + $0x48] sm:$0xff]   ;;  %v64_v42 = vld [vmem:[%s1821_s0 + $0x18] sm:$0xff]  ;;  %v107_v14 = vlaneseq }
  0x33   :  { %v1476_v36 = vld [vmem:[#allocation4 + $0xc0] sm:$0xff]   ;;  %v1480_v43 = vld [vmem:[#allocation4 + $0xc8] sm:$0xff]   ;;  %v1482_v46 = vld [vmem:[#allocation4 + $0x50] sm:$0xff]   ;;  %v70_v48 = vpack.c.bf16 %v64_v42, %v63_v41 }
  0x34   :  { %v1475_v38 = vld [vmem:[#allocation4] sm:$0xff]   ;;  %v1479_v44 = vld [vmem:[#allocation4 + $0x8] sm:$0xff]   ;;  %v1484_v47 = vld [vmem:[#allocation4 + $0xd0] sm:$0xff]  }
  0x35   :  { %294 = vmatpush1.bf16.msra.mxu0 %v1448_v15  ;;  %367 = vmatpush1.bf16.msra.mxu1 %v1449_v16  ;;  %v1477_v39 = vld [vmem:[#allocation4 + $0x80] sm:$0xff]   ;;  %v1481_v45 = vld [vmem:[#allocation4 + $0x88] sm:$0xff]   ;;  %v1483_v49 = vld [vmem:[#allocation4 + $0x10] sm:$0xff]   ;;  %v108_v15 = vshrl.u32 %v107_v14, 7 }
  0x36   :  { %295 = vmatprep.subr.bf16.mxu0 %v1450_v17  ;;  %368 = vmatprep.subr.bf16.mxu1 %v1452_v18  ;;  %v1485_v50 = vld [vmem:[#allocation4 + $0x90] sm:$0xff]   ;;  %v1486_v51 = vld [vmem:[#allocation4 + $0x58] sm:$0xff]   ;;  %v65_v52 = vld [vmem:[%s1821_s0 + $0x20] sm:$0xff] }
  0x37   :  { %v66_v53 = vld [vmem:[%s1821_s0 + $0x28] sm:$0xff]  ;;  %v1488_v54 = vld [vmem:[#allocation4 + $0xd8] sm:$0xff]   ;;  %v1490_v57 = vld [vmem:[#allocation4 + $0x60] sm:$0xff]   ;;  %v109_v16 = vsub.s32 0, %v108_v15  ;;  %v117_v17 = vsub.s32 2, %v108_v15 }
  0x38   :  { %v1487_v55 = vld [vmem:[#allocation4 + $0x18] sm:$0xff]   ;;  %v1492_v58 = vld [vmem:[#allocation4 + $0xe0] sm:$0xff]   ;;  %v71_v59 = vpack.c.bf16 %v66_v53, %v65_v52  ;;  %v1494_v62 = vld [vmem:[#allocation4 + $0x68] sm:$0xff]  }
  0x39   :  { %296 = vmatpush1.bf16.msra.mxu0 %v1454_v19  ;;  %369 = vmatpush1.bf16.msra.mxu1 %v1455_v20  ;;  %v1489_v56 = vld [vmem:[#allocation4 + $0x98] sm:$0xff]   ;;  %v1491_v60 = vld [vmem:[#allocation4 + $0x20] sm:$0xff]   ;;  %v1496_v63 = vld [vmem:[#allocation4 + $0xe8] sm:$0xff]   ;;  %v113_v19 = vsub.s32 1, %v108_v15  ;;  %v121_v20 = vsub.s32 3, %v108_v15 }
  0x3a   :  { %297 = vmatprep.subr.bf16.mxu0 %v1456_v21  ;;  %370 = vmatprep.subr.bf16.mxu1 %v1458_v22  ;;  %v1493_v61 = vld [vmem:[#allocation4 + $0xa0] sm:$0xff]   ;;  %v67_v1 = vld [vmem:[%s1821_s0 + $0x30] sm:$0xff]  ;;  %v68_v2 = vld [vmem:[%s1821_s0 + $0x38] sm:$0xff] }
  0x3b   :  { %v1495_v3 = vld [vmem:[#allocation4 + $0x28] sm:$0xff]   ;;  %v72_v4 = vpack.c.bf16 %v68_v2, %v67_v1  ;;  %v1498_v6 = vld [vmem:[#allocation4 + $0x70] sm:$0xff]   ;;  %v1502_v10 = vld [vmem:[#allocation4 + $0x78] sm:$0xff]  }
  0x3c   :  { %v1497_v5 = vld [vmem:[#allocation4 + $0xa8] sm:$0xff]   ;;  %v1500_v7 = vld [vmem:[#allocation4 + $0xf0] sm:$0xff]   ;;  %v1503_v11 = vld [vmem:[#allocation4 + $0x38] sm:$0xff]  }
  0x3d   :  { %298 = vmatpush1.bf16.msra.mxu0 %v1460_v23  ;;  %371 = vmatpush1.bf16.msra.mxu1 %v1461_v24  ;;  %v1499_v8 = vld [vmem:[#allocation4 + $0x30] sm:$0xff]   ;;  %v1505_v12 = vld [vmem:[#allocation4 + $0xb8] sm:$0xff]   ;;  %v1686_v13 = vld [vmem:[%s1826_s5] sm:$0xff]  }
  0x3e   :  { %299 = vmatprep.subr.bf16.mxu0 %v1462_v25  ;;  %372 = vmatprep.subr.bf16.mxu1 %v1464_v26  ;;  %v1501_v9 = vld [vmem:[#allocation4 + $0xb0] sm:$0xff]   ;;  %v105_v18 = vld [vmem:[%s1823_s2] sm:$0xf] }
  0x3f   :  { %v1692_v21 = vrot.slane %v105_v18, %v109_v16  ;;  %v1694_v22 = vrot.slane %v105_v18, %v117_v17  ;;  %v1696_v23 = vrot.slane %v105_v18, %v113_v19  ;;  %v1698_v24 = vrot.slane %v105_v18, %v121_v20 }
  0x41   :  { %300 = vmatpush1.bf16.msra.mxu0 %v1466_v27  ;;  %373 = vmatpush1.bf16.msra.mxu1 %v1467_v28 }
  0x42   :  { %301 = vmatprep.subr.bf16.mxu0 %v1468_v29  ;;  %374 = vmatprep.subr.bf16.mxu1 %v1470_v30 }
  0x45   :  { %302 = vmatpush1.bf16.msra.mxu0 %v1472_v31  ;;  %375 = vmatpush1.bf16.msra.mxu1 %v1473_v32 }
  0x46   :  { %1267 = vmatprep.subr.bf16.mxu0 %v1474_v35  ;;  %1307 = vmatprep.subr.bf16.mxu1 %v1476_v36 }
  0x48   :  { %320 = vmatmul.mubr.bf16.vlgmr.msra.gmra.mrb[0].mxu0 %v69_v37  ;;  %393 = vmatmul.mubr.bf16.vlgmr.msra.gmra.mrb[0].mxu1 %v69_v37 }
  0x49   :  { %329 = vmatprep.mubr.bf16.mxu0 %v1576_v0  ;;  %402 = vmatprep.mubr.bf16.mxu1 %v1576_v0 }
  0x4a   :  { %1268 = vmatpush3.bf16.msra.mxu0 %v1475_v38  ;;  %1308 = vmatpush3.bf16.msra.mxu1 %v1477_v39 }
  0x4b   :  { %1269 = vmatprep.subr.bf16.mxu0 %v1478_v40  ;;  %1309 = vmatprep.subr.bf16.mxu1 %v1480_v43 }
  0x4e   :  { %1270 = vmatpush3.bf16.msra.mxu0 %v1479_v44  ;;  %1310 = vmatpush3.bf16.msra.mxu1 %v1481_v45 }
  0x4f   :  { %1271 = vmatprep.subr.bf16.mxu0 %v1482_v46  ;;  %1311 = vmatprep.subr.bf16.mxu1 %v1484_v47 }
  0x50   :  { %330 = vmatmul.mubr.bf16.gmra.mrb[4].mxu0 %v70_v48  ;;  %403 = vmatmul.mubr.bf16.gmra.mrb[4].mxu1 %v70_v48 }
  0x51   :  { %339 = vmatprep.mubr.bf16.mxu0 %v1576_v0  ;;  %412 = vmatprep.mubr.bf16.mxu1 %v1576_v0 }
  0x52   :  { %1272 = vmatpush3.bf16.msra.mxu0 %v1483_v49  ;;  %1312 = vmatpush3.bf16.msra.mxu1 %v1485_v50 }
  0x53   :  { %1273 = vmatprep.subr.bf16.mxu0 %v1486_v51  ;;  %1313 = vmatprep.subr.bf16.mxu1 %v1488_v54 }
  0x56   :  { %1274 = vmatpush3.bf16.msra.mxu0 %v1487_v55  ;;  %1314 = vmatpush3.bf16.msra.mxu1 %v1489_v56 }
  0x57   :  { %1275 = vmatprep.subr.bf16.mxu0 %v1490_v57  ;;  %1315 = vmatprep.subr.bf16.mxu1 %v1492_v58 }
  0x58   :  { %340 = vmatmul.mubr.bf16.gmra.mrb[8].mxu0 %v71_v59  ;;  %413 = vmatmul.mubr.bf16.gmra.mrb[8].mxu1 %v71_v59  ;;  %v1507_v59 = vld [vmem:[%s1826_s5 + $0x8] sm:$0xff]  }
  0x59   :  { %349 = vmatprep.mubr.bf16.mxu0 %v1576_v0  ;;  %422 = vmatprep.mubr.bf16.mxu1 %v1576_v0  ;;  %v1504_v0 = vld [vmem:[#allocation4 + $0xf8] sm:$0xff]  }
  0x5a   :  { %1276 = vmatpush3.bf16.msra.mxu0 %v1491_v60  ;;  %1316 = vmatpush3.bf16.msra.mxu1 %v1493_v61 }
  0x5b   :  { %1277 = vmatprep.subr.bf16.mxu0 %v1494_v62  ;;  %1317 = vmatprep.subr.bf16.mxu1 %v1496_v63 }
  0x5e   :  { %1278 = vmatpush3.bf16.msra.mxu0 %v1495_v3  ;;  %1318 = vmatpush3.bf16.msra.mxu1 %v1497_v5 }
  0x5f   :  { %1279 = vmatprep.subr.bf16.mxu0 %v1498_v6  ;;  %1319 = vmatprep.subr.bf16.mxu1 %v1500_v7 }
  0x60   :  { %350 = vmatmul.mubr.bf16.gmra.mrb[12].mxu0 %v72_v4  ;;  %423 = vmatmul.mubr.bf16.gmra.mrb[12].mxu1 %v72_v4 }
  0x62   :  { %1280 = vmatpush3.bf16.msra.mxu0 %v1499_v8  ;;  %1320 = vmatpush3.bf16.msra.mxu1 %v1501_v9 }
  0x63   :  { %1281 = vmatprep.subr.bf16.mxu0 %v1502_v10  ;;  %1321 = vmatprep.subr.bf16.mxu1 %v1504_v0 }
  0x66   :  { %1282 = vmatpush3.bf16.msra.mxu0 %v1503_v11  ;;  %1322 = vmatpush3.bf16.msra.mxu1 %v1505_v12  ;;  %v1508_v11 = vld [vmem:[%s1826_s5 + $0x10] sm:$0xff]  }
  0x67   :  { %1371 = vmatprep.subr.bf16.mxu0 %v1686_v13 }
 0x11b   :  { %v321_v25 = vpop.f32.mrb[0].mxu0  ;;  %v394_v26 = vpop.f32.mrb[0].mxu1 }
 0x11c   :  { %v322_v27 = vadd.f32 %v321_v25, %v1692_v21  ;;  %v395_v28 = vadd.f32 %v394_v26, %v1694_v22  ;;  %v323_v29 = vpop.f32.mrb[1].mxu0  ;;  %v396_v30 = vpop.f32.mrb[1].mxu1 }
 0x11d   :  { %v324_v31 = vadd.f32 %v323_v29, %v1696_v23  ;;  %v397_v32 = vadd.f32 %v396_v30, %v1698_v24  ;;  %v325_v33 = vpop.f32.mrb[2].mxu0  ;;  %v398_v34 = vpop.f32.mrb[2].mxu1 }
 0x11e   :  { %v435_v35 = vmax.f32 %v395_v28, 0.0  ;;  %v326_v36 = vadd.f32 %v325_v33, %v1692_v21  ;;  %v399_v37 = vadd.f32 %v398_v34, %v1694_v22  ;;  %v327_v38 = vpop.f32.mrb[3].mxu0  ;;  %v400_v39 = vpop.f32.mrb[3].mxu1  ;;  %v433_v43 = vmax.f32 %v322_v27, 0.0 }
 0x11f   :  { %v436_v40 = vmax.f32 %v397_v32, 0.0  ;;  %v328_v41 = vadd.f32 %v327_v38, %v1696_v23  ;;  %v401_v42 = vadd.f32 %v400_v39, %v1698_v24  ;;  %v434_v46 = vmax.f32 %v324_v31, 0.0 }
 0x120   :  { %v437_v44 = vmax.f32 %v326_v36, 0.0  ;;  %v439_v45 = vmax.f32 %v399_v37, 0.0 }
 0x121   :  { %v438_v47 = vmax.f32 %v328_v41, 0.0  ;;  %v440_v48 = vmax.f32 %v401_v42, 0.0 }
 0x122   :  { %v465_v49 = vpack.c.bf16 %v437_v44, %v433_v43  ;;  %v467_v50 = vpack.c.bf16 %v439_v45, %v435_v35 }
 0x123   :  { %v466_v51 = vpack.c.bf16 %v438_v47, %v434_v46  ;;  %v468_v52 = vpack.c.bf16 %v440_v48, %v436_v40  ;;  %v331_v53 = vpop.f32.mrb[4].mxu0  ;;  %v404_v54 = vpop.f32.mrb[4].mxu1 }
 0x124   :  { %v332_v55 = vadd.f32 %v331_v53, %v1692_v21  ;;  %v405_v56 = vadd.f32 %v404_v54, %v1694_v22  ;;  %v333_v57 = vpop.f32.mrb[5].mxu0  ;;  %v406_v58 = vpop.f32.mrb[5].mxu1 }
 0x125   :  { %v334_v60 = vadd.f32 %v333_v57, %v1696_v23  ;;  %v407_v61 = vadd.f32 %v406_v58, %v1698_v24  ;;  %v335_v62 = vpop.f32.mrb[6].mxu0  ;;  %v408_v63 = vpop.f32.mrb[6].mxu1  ;;  %776 = vmatprep.mubr.bf16.mxu0 %v466_v51  ;;  %841 = vmatprep.mubr.bf16.mxu1 %v468_v52 }
 0x126   :  { %v443_v1 = vmax.f32 %v405_v56, 0.0  ;;  %v336_v2 = vadd.f32 %v335_v62, %v1692_v21  ;;  %v409_v3 = vadd.f32 %v408_v63, %v1694_v22  ;;  %v337_v4 = vpop.f32.mrb[7].mxu0  ;;  %v410_v5 = vpop.f32.mrb[7].mxu1  ;;  %777 = vmatmul.mubr.bf16.vlgmr.msra.gmra.mrb[16].mxu0 %v465_v49  ;;  %842 = vmatmul.mubr.bf16.vlgmr.msra.gmra.mrb[16].mxu1 %v467_v50  ;;  %v441_v9 = vmax.f32 %v332_v55, 0.0 }
 0x127   :  { %v444_v6 = vmax.f32 %v407_v61, 0.0  ;;  %v338_v7 = vadd.f32 %v337_v4, %v1696_v23  ;;  %v411_v8 = vadd.f32 %v410_v5, %v1698_v24  ;;  %1372 = vmatpush3.bf16.msra.mxu0 %v1686_v13  ;;  %v442_v12 = vmax.f32 %v334_v60, 0.0 }
 0x128   :  { %v445_v10 = vmax.f32 %v336_v2, 0.0  ;;  %v447_v0 = vmax.f32 %v409_v3, 0.0  ;;  %1373 = vmatprep.subr.bf16.mxu0 %v1507_v59 }
 0x129   :  { %v446_v14 = vmax.f32 %v338_v7, 0.0  ;;  %v448_v15 = vmax.f32 %v411_v8, 0.0 }
 0x12a   :  { %v469_v16 = vpack.c.bf16 %v445_v10, %v441_v9  ;;  %v471_v17 = vpack.c.bf16 %v447_v0, %v443_v1 }
 0x12b   :  { %v470_v18 = vpack.c.bf16 %v446_v14, %v442_v12  ;;  %v472_v19 = vpack.c.bf16 %v448_v15, %v444_v6  ;;  %v341_v20 = vpop.f32.mrb[8].mxu0  ;;  %v414_v25 = vpop.f32.mrb[8].mxu1  ;;  %1374 = vmatpush3.bf16.msra.mxu0 %v1507_v59  ;;  %v1512_v15 = vld [vmem:[%s1826_s5 + $0x30] sm:$0xff]  }
 0x12c   :  { %v342_v13 = vadd.f32 %v341_v20, %v1692_v21  ;;  %v415_v26 = vadd.f32 %v414_v25, %v1694_v22  ;;  %v343_v27 = vpop.f32.mrb[9].mxu0  ;;  %v416_v28 = vpop.f32.mrb[9].mxu1  ;;  %1375 = vmatprep.subr.bf16.mxu0 %v1508_v11  ;;  %v1517_v20 = vld [vmem:[%s1828_s7 + $0x18] sm:$0xff]   ;;  %v1518_v25 = vld [vmem:[%s1828_s7 + $0x20] sm:$0xff]  }
 0x12d   :  { %v344_v29 = vadd.f32 %v343_v27, %v1696_v23  ;;  %v417_v30 = vadd.f32 %v416_v28, %v1698_v24  ;;  %v345_v31 = vpop.f32.mrb[10].mxu0  ;;  %v418_v32 = vpop.f32.mrb[10].mxu1  ;;  %784 = vmatprep.mubr.bf16.mxu0 %v470_v18  ;;  %849 = vmatprep.mubr.bf16.mxu1 %v472_v19  ;;  %v1515_v18 = vld [vmem:[%s1828_s7 + $0x8] sm:$0xff]   ;;  %v1516_v19 = vld [vmem:[%s1828_s7 + $0x10] sm:$0xff]   ;;  %v1775_v28 = vld [vmem:[%s1825_s4] ss:$0 sm:$0xff] }
 0x12e   :  { %v451_v33 = vmax.f32 %v415_v26, 0.0  ;;  %v346_v34 = vadd.f32 %v345_v31, %v1692_v21  ;;  %v419_v35 = vadd.f32 %v418_v32, %v1694_v22  ;;  %v347_v36 = vpop.f32.mrb[11].mxu0  ;;  %v420_v37 = vpop.f32.mrb[11].mxu1  ;;  %785 = vmatmul.mubr.bf16.gmra.mrb[20].mxu0 %v469_v16  ;;  %850 = vmatmul.mubr.bf16.gmra.mrb[20].mxu1 %v471_v17  ;;  %v449_v41 = vmax.f32 %v342_v13, 0.0  ;;  %v1513_v16 = vld [vmem:[%s1826_s5 + $0x38] sm:$0xff]   ;;  %v1514_v17 = vld [vmem:[%s1828_s7] sm:$0xff]  }
 0x12f   :  { %v452_v38 = vmax.f32 %v417_v30, 0.0  ;;  %v348_v39 = vadd.f32 %v347_v36, %v1696_v23  ;;  %v421_v40 = vadd.f32 %v420_v37, %v1698_v24  ;;  %1376 = vmatpush3.bf16.msra.mxu0 %v1508_v11  ;;  %v450_v44 = vmax.f32 %v344_v29, 0.0  ;;  %1395 = vmatprep.subr.bf16.mxu1 %v1514_v17  ;;  %v1519_v13 = vld [vmem:[%s1828_s7 + $0x28] sm:$0xff]  }
 0x130   :  { %v453_v42 = vmax.f32 %v346_v34, 0.0  ;;  %v455_v43 = vmax.f32 %v419_v35, 0.0  ;;  %1396 = vmatpush3.bf16.msra.mxu1 %v1514_v17 }
 0x131   :  { %v454_v45 = vmax.f32 %v348_v39, 0.0  ;;  %v456_v46 = vmax.f32 %v421_v40, 0.0  ;;  %1397 = vmatprep.subr.bf16.mxu1 %v1515_v18 }
 0x132   :  { %v473_v47 = vpack.c.bf16 %v453_v42, %v449_v41  ;;  %v475_v48 = vpack.c.bf16 %v455_v43, %v451_v33 }
 0x133   :  { %v474_v49 = vpack.c.bf16 %v454_v45, %v450_v44  ;;  %v476_v50 = vpack.c.bf16 %v456_v46, %v452_v38  ;;  %v351_v51 = vpop.f32.mrb[12].mxu0  ;;  %v424_v52 = vpop.f32.mrb[12].mxu1 }
 0x134   :  { %v352_v53 = vadd.f32 %v351_v51, %v1692_v21  ;;  %v425_v54 = vadd.f32 %v424_v52, %v1694_v22  ;;  %v353_v55 = vpop.f32.mrb[13].mxu0  ;;  %v426_v56 = vpop.f32.mrb[13].mxu1  ;;  %1398 = vmatpush3.bf16.msra.mxu1 %v1515_v18 }
 0x135   :  { %v354_v57 = vadd.f32 %v353_v55, %v1696_v23  ;;  %v427_v58 = vadd.f32 %v426_v56, %v1698_v24  ;;  %v355_v59 = vpop.f32.mrb[14].mxu0  ;;  %v428_v60 = vpop.f32.mrb[14].mxu1  ;;  %792 = vmatprep.mubr.bf16.mxu0 %v474_v49  ;;  %857 = vmatprep.mubr.bf16.mxu1 %v476_v50 }
 0x136   :  { %v459_v61 = vmax.f32 %v425_v54, 0.0  ;;  %v356_v62 = vadd.f32 %v355_v59, %v1692_v21  ;;  %v429_v63 = vadd.f32 %v428_v60, %v1694_v22  ;;  %v357_v1 = vpop.f32.mrb[15].mxu0  ;;  %v430_v2 = vpop.f32.mrb[15].mxu1  ;;  %793 = vmatmul.mubr.bf16.gmra.mrb[24].mxu0 %v473_v47  ;;  %858 = vmatmul.mubr.bf16.gmra.mrb[24].mxu1 %v475_v48  ;;  %v457_v6 = vmax.f32 %v352_v53, 0.0  ;;  %v1509_v22 = vld [vmem:[%s1826_s5 + $0x18] sm:$0xff]  }
 0x137   :  { %v460_v3 = vmax.f32 %v427_v58, 0.0  ;;  %v358_v4 = vadd.f32 %v357_v1, %v1696_v23  ;;  %v431_v5 = vadd.f32 %v430_v2, %v1698_v24  ;;  %v458_v9 = vmax.f32 %v354_v57, 0.0  ;;  %1377 = vmatprep.subr.bf16.mxu0 %v1509_v22  ;;  %v1510_v23 = vld [vmem:[%s1826_s5 + $0x20] sm:$0xff]   ;;  %v1511_v24 = vld [vmem:[%s1826_s5 + $0x28] sm:$0xff]   ;;  %1399 = vmatprep.subr.bf16.mxu1 %v1516_v19 }
 0x138   :  { %v461_v7 = vmax.f32 %v356_v62, 0.0  ;;  %v463_v8 = vmax.f32 %v429_v63, 0.0  ;;  %1378 = vmatpush3.bf16.msra.mxu0 %v1509_v22  ;;  %1400 = vmatpush3.bf16.msra.mxu1 %v1516_v19 }
 0x139   :  { %v462_v10 = vmax.f32 %v358_v4, 0.0  ;;  %v464_v0 = vmax.f32 %v431_v5, 0.0  ;;  %1379 = vmatprep.subr.bf16.mxu0 %v1510_v23  ;;  %1401 = vmatprep.subr.bf16.mxu1 %v1517_v20 }
 0x13a   :  { %v477_v11 = vpack.c.bf16 %v461_v7, %v457_v6  ;;  %v479_v12 = vpack.c.bf16 %v463_v8, %v459_v61 }
 0x13b   :  { %v478_v21 = vpack.c.bf16 %v462_v10, %v458_v9  ;;  %v480_v14 = vpack.c.bf16 %v464_v0, %v460_v3 }
 0x13c   :  { %1380 = vmatpush3.bf16.msra.mxu0 %v1510_v23  ;;  %1402 = vmatpush3.bf16.msra.mxu1 %v1517_v20 }
 0x13d   :  { %800 = vmatprep.mubr.bf16.mxu0 %v478_v21  ;;  %865 = vmatprep.mubr.bf16.mxu1 %v480_v14 }
 0x13e   :  { %801 = vmatmul.mubr.bf16.gmra.mrb[28].mxu0 %v477_v11  ;;  %866 = vmatmul.mubr.bf16.gmra.mrb[28].mxu1 %v479_v12 }
 0x13f   :  { %1381 = vmatprep.subr.bf16.mxu0 %v1511_v24  ;;  %1403 = vmatprep.subr.bf16.mxu1 %v1518_v25 }
 0x140   :  { %1382 = vmatpush3.bf16.msra.mxu0 %v1511_v24  ;;  %1404 = vmatpush3.bf16.msra.mxu1 %v1518_v25 }
 0x141   :  { %1383 = vmatprep.subr.bf16.mxu0 %v1512_v15  ;;  %1405 = vmatprep.subr.bf16.mxu1 %v1519_v13 }
 0x144   :  { %1384 = vmatpush3.bf16.msra.mxu0 %v1512_v15  ;;  %1406 = vmatpush3.bf16.msra.mxu1 %v1519_v13 }
 0x145   :  { %1385 = vmatprep.subr.bf16.mxu0 %v1513_v16 }
 0x148   :  { %1386 = vmatpush3.bf16.msra.mxu0 %v1513_v16 }
 0x1f9   :  { %v1283_v26 = vpop.f32.mrb[16].mxu0  ;;  %v1323_v27 = vpop.f32.mrb[16].mxu1 }
 0x1fa   :  { %v1284_v29 = vpop.f32.mrb[17].mxu0  ;;  %v1324_v30 = vpop.f32.mrb[17].mxu1 }
 0x1fb   :  { %v1285_v31 = vadd.f32 %v1284_v29, %v1283_v26  ;;  %v1325_v32 = vadd.f32 %v1324_v30, %v1323_v27  ;;  %v1286_v33 = vpop.f32.mrb[18].mxu0  ;;  %v1326_v34 = vpop.f32.mrb[18].mxu1 }
 0x1fc   :  { %v1287_v35 = vpop.f32.mrb[19].mxu0  ;;  %v1327_v36 = vpop.f32.mrb[19].mxu1 }
 0x1fd   :  { %v779_v37 = vadd.f32 %v1285_v31, %v1775_v28  ;;  %v1288_v38 = vadd.f32 %v1287_v35, %v1286_v33  ;;  %v1328_v39 = vadd.f32 %v1327_v36, %v1326_v34 }
 0x1ff   :  { %v844_v40 = vadd.f32 %v1325_v32, %v779_v37  ;;  %v782_v41 = vadd.f32 %v1288_v38, %v1775_v28 }
 0x201   :  { %v847_v42 = vadd.f32 %v1328_v39, %v782_v41  ;;  %v1289_v43 = vpop.f32.mrb[20].mxu0  ;;  %v1329_v44 = vpop.f32.mrb[20].mxu1  ;;  %v874_v47 = vmax.f32 %v844_v40, 0.0  ;;  %v1520_v40 = vld [vmem:[%s1828_s7 + $0x30] sm:$0xff]   ;;  %v1521_v41 = vld [vmem:[%s1828_s7 + $0x38] sm:$0xff]  }
 0x202   :  { %v1290_v45 = vpop.f32.mrb[21].mxu0  ;;  %v1330_v46 = vpop.f32.mrb[21].mxu1  ;;  %1407 = vmatprep.subr.bf16.mxu1 %v1520_v40 }
 0x203   :  { %v875_v48 = vmax.f32 %v847_v42, 0.0  ;;  %v1291_v49 = vadd.f32 %v1290_v45, %v1289_v43  ;;  %v1331_v50 = vadd.f32 %v1330_v46, %v1329_v44  ;;  %v1292_v51 = vpop.f32.mrb[22].mxu0  ;;  %v1332_v52 = vpop.f32.mrb[22].mxu1  ;;  %1408 = vmatpush3.bf16.msra.mxu1 %v1520_v40 }
 0x204   :  { %v1293_v53 = vpop.f32.mrb[23].mxu0  ;;  %v1333_v54 = vpop.f32.mrb[23].mxu1  ;;  %1409 = vmatprep.subr.bf16.mxu1 %v1521_v41 }
 0x205   :  { %v787_v55 = vadd.f32 %v1291_v49, %v1775_v28  ;;  %v1294_v56 = vadd.f32 %v1293_v53, %v1292_v51  ;;  %v1334_v57 = vadd.f32 %v1333_v54, %v1332_v52  ;;  %v882_v58 = vpack.c.bf16 %v875_v48, %v874_v47 }
 0x207   :  { %v852_v59 = vadd.f32 %v1331_v50, %v787_v55  ;;  %v790_v60 = vadd.f32 %v1294_v56, %v1775_v28  ;;  %1387 = vmatprep.mubr.bf16.mxu0 %v882_v58  ;;  %1410 = vmatpush3.bf16.msra.mxu1 %v1521_v41 }
 0x209   :  { %v855_v61 = vadd.f32 %v1334_v57, %v790_v60  ;;  %v1295_v62 = vpop.f32.mrb[24].mxu0  ;;  %v1335_v63 = vpop.f32.mrb[24].mxu1  ;;  %v876_v3 = vmax.f32 %v852_v59, 0.0 }
 0x20a   :  { %v1296_v1 = vpop.f32.mrb[25].mxu0  ;;  %v1336_v2 = vpop.f32.mrb[25].mxu1 }
 0x20b   :  { %v877_v4 = vmax.f32 %v855_v61, 0.0  ;;  %v1297_v5 = vadd.f32 %v1296_v1, %v1295_v62  ;;  %v1337_v6 = vadd.f32 %v1336_v2, %v1335_v63  ;;  %v1298_v7 = vpop.f32.mrb[26].mxu0  ;;  %v1338_v8 = vpop.f32.mrb[26].mxu1 }
 0x20c   :  { %v1299_v9 = vpop.f32.mrb[27].mxu0  ;;  %v1339_v10 = vpop.f32.mrb[27].mxu1 }
 0x20d   :  { %v883_v0 = vpack.c.bf16 %v877_v4, %v876_v3  ;;  %v795_v11 = vadd.f32 %v1297_v5, %v1775_v28  ;;  %v1300_v12 = vadd.f32 %v1299_v9, %v1298_v7  ;;  %v1340_v21 = vadd.f32 %v1339_v10, %v1338_v8  ;;  %v1258_v7 = vld [vmem:[%s1829_s8] ss:$0 sm:$0xff] }
 0x20f   :  { %v860_v14 = vadd.f32 %v1337_v6, %v795_v11  ;;  %v798_v22 = vadd.f32 %v1300_v12, %v1775_v28  ;;  %1388 = vmatmul.mubr.bf16.vlgmr.msra.gmra.mrb[32].mxu0 %v883_v0 }
 0x211   :  { %v863_v23 = vadd.f32 %v1340_v21, %v798_v22  ;;  %v1301_v24 = vpop.f32.mrb[28].mxu0  ;;  %v1341_v15 = vpop.f32.mrb[28].mxu1  ;;  %v878_v18 = vmax.f32 %v860_v14, 0.0 }
 0x212   :  { %v1302_v16 = vpop.f32.mrb[29].mxu0  ;;  %v1342_v17 = vpop.f32.mrb[29].mxu1 }
 0x213   :  { %v879_v19 = vmax.f32 %v863_v23, 0.0  ;;  %v1303_v20 = vadd.f32 %v1302_v16, %v1301_v24  ;;  %v1343_v25 = vadd.f32 %v1342_v17, %v1341_v15  ;;  %v1304_v13 = vpop.f32.mrb[30].mxu0  ;;  %v1344_v26 = vpop.f32.mrb[30].mxu1 }
 0x214   :  { %v1305_v27 = vpop.f32.mrb[31].mxu0  ;;  %v1345_v29 = vpop.f32.mrb[31].mxu1 }
 0x215   :  { %v803_v30 = vadd.f32 %v1303_v20, %v1775_v28  ;;  %v1306_v31 = vadd.f32 %v1305_v27, %v1304_v13  ;;  %v1346_v32 = vadd.f32 %v1345_v29, %v1344_v26  ;;  %v884_v33 = vpack.c.bf16 %v879_v19, %v878_v18 }
 0x217   :  { %v868_v34 = vadd.f32 %v1343_v25, %v803_v30  ;;  %v806_v35 = vadd.f32 %v1306_v31, %v1775_v28  ;;  %1391 = vmatprep.mubr.bf16.mxu0 %v884_v33  ;;  %v1249_v28 = vld [vmem:[%s1827_s6] ss:$0 sm:$0xff] }
 0x219   :  { %v871_v36 = vadd.f32 %v1346_v32, %v806_v35  ;;  %v880_v37 = vmax.f32 %v868_v34, 0.0 }
 0x21b   :  { %v881_v38 = vmax.f32 %v871_v36, 0.0 }
 0x21d   :  { %v885_v39 = vpack.c.bf16 %v881_v38, %v880_v37 }
 0x21f   :  { %1392 = vmatmul.mubr.bf16.gmra.mrb[36].mxu0 %v885_v39 }
 0x2e2   :  { %v1389_v42 = vpop.f32.mrb[32].mxu0 }
 0x2e3   :  { %v1000_v43 = vadd.f32 %v1389_v42, %v1249_v28  ;;  %v991_v44 = vpop.f32.mrb[33].mxu0 }
 0x2e4   :  { %v992_v45 = vadd.f32 %v1249_v28, %v991_v44  ;;  %v1390_v46 = vpop.f32.mrb[34].mxu0 }
 0x2e5   :  { %v1003_v47 = vadd.f32 %v1390_v46, %v1249_v28  ;;  %v994_v48 = vpop.f32.mrb[35].mxu0  ;;  %v1024_v50 = vmax.f32 %v1000_v43, 0.0 }
 0x2e6   :  { %v995_v49 = vadd.f32 %v1249_v28, %v994_v48  ;;  %v1022_v52 = vmax.f32 %v992_v45, 0.0 }
 0x2e7   :  { %v1025_v51 = vmax.f32 %v1003_v47, 0.0 }
 0x2e8   :  { %v1023_v53 = vmax.f32 %v995_v49, 0.0 }
 0x2e9   :  { %v1031_v54 = vpack.c.bf16 %v1025_v51, %v1024_v50 }
 0x2ea   :  { %v1030_v55 = vpack.c.bf16 %v1023_v53, %v1022_v52 }
 0x2ec   :  { %1411 = vmatprep.mubr.bf16.mxu1 %v1030_v55 }
 0x2ed   :  { %1412 = vmatmul.mubr.bf16.vlgmr.msra.gmra.mrb[32].mxu1 %v1031_v54 }
 0x2f2   :  { %v1393_v56 = vpop.f32.mrb[36].mxu0 }
 0x2f3   :  { %v1016_v57 = vadd.f32 %v1393_v56, %v1249_v28  ;;  %v1007_v58 = vpop.f32.mrb[37].mxu0 }
 0x2f4   :  { %v1008_v59 = vadd.f32 %v1249_v28, %v1007_v58  ;;  %v1394_v60 = vpop.f32.mrb[38].mxu0 }
 0x2f5   :  { %v1019_v61 = vadd.f32 %v1394_v60, %v1249_v28  ;;  %v1010_v62 = vpop.f32.mrb[39].mxu0  ;;  %v1028_v1 = vmax.f32 %v1016_v57, 0.0 }
 0x2f6   :  { %v1011_v63 = vadd.f32 %v1249_v28, %v1010_v62  ;;  %v1026_v3 = vmax.f32 %v1008_v59, 0.0 }
 0x2f7   :  { %v1029_v2 = vmax.f32 %v1019_v61, 0.0 }
 0x2f8   :  { %v1027_v4 = vmax.f32 %v1011_v63, 0.0 }
 0x2f9   :  { %v1033_v5 = vpack.c.bf16 %v1029_v2, %v1028_v1 }
 0x2fa   :  { %v1032_v6 = vpack.c.bf16 %v1027_v4, %v1026_v3 }
 0x2fc   :  { %1415 = vmatprep.mubr.bf16.mxu1 %v1032_v6 }
 0x2fd   :  { %1416 = vmatmul.mubr.bf16.gmra.mrb[36].mxu1 %v1033_v5 }
 0x3c0   :  { %v1413_v8 = vpop.f32.mrb[32].mxu1 }
 0x3c1   :  { %v1148_v9 = vadd.f32 %v1413_v8, %v1258_v7  ;;  %v1139_v10 = vpop.f32.mrb[33].mxu1 }
 0x3c2   :  { %v1140_v0 = vadd.f32 %v1258_v7, %v1139_v10  ;;  %v1414_v11 = vpop.f32.mrb[34].mxu1 }
 0x3c3   :  { %1172 = vst [vmem:[%s1830_s9 + $0x10] sm:$0xff] %v1148_v9  ;;  %v1151_v12 = vadd.f32 %v1414_v11, %v1258_v7  ;;  %v1142_v21 = vpop.f32.mrb[35].mxu1 }
 0x3c4   :  { %1170 = vst [vmem:[%s1830_s9] sm:$0xff] %v1140_v0  ;;  %v1143_v14 = vadd.f32 %v1258_v7, %v1142_v21 }
 0x3c5   :  { %1173 = vst [vmem:[%s1830_s9 + $0x18] sm:$0xff] %v1151_v12 }
 0x3c6   :  { %1171 = vst [vmem:[%s1830_s9 + $0x8] sm:$0xff] %v1143_v14 }
 0x3d0   :  { %v1417_v22 = vpop.f32.mrb[36].mxu1 }
 0x3d1   :  { %v1164_v23 = vadd.f32 %v1417_v22, %v1258_v7  ;;  %v1155_v24 = vpop.f32.mrb[37].mxu1 }
 0x3d2   :  { %v1156_v15 = vadd.f32 %v1258_v7, %v1155_v24  ;;  %v1418_v16 = vpop.f32.mrb[38].mxu1 }
 0x3d3   :  { %1176 = vst [vmem:[%s1830_s9 + $0x30] sm:$0xff] %v1164_v23  ;;  %v1167_v17 = vadd.f32 %v1418_v16, %v1258_v7  ;;  %v1158_v18 = vpop.f32.mrb[39].mxu1 }
 0x3d4   :  { %1174 = vst [vmem:[%s1830_s9 + $0x20] sm:$0xff] %v1156_v15  ;;  %v1159_v19 = vadd.f32 %v1258_v7, %v1158_v18 }
 0x3d5   :  { %1177 = vst [vmem:[%s1830_s9 + $0x38] sm:$0xff] %v1167_v17 }
 0x3d6   :  { %1175 = vst [vmem:[%s1830_s9 + $0x28] sm:$0xff] %v1159_v19 }
 0x3d7   :  { %1182 = vsyncpa [#allocation3], 1 }
 0x3d8   :  { %1183 = vsyncpa [#allocation5], 1 }

</bundles_post_ra>
